<compile_context>
chip_gen: v7x
topology: tpu7x:2x2x1
jax: 0.10.0
libtpu: 0.0.40
codegen_flags: <defaults>
</compile_context>

<pallas_src>
import functools

import jax
import jax.numpy as jnp
from jax.experimental import pallas as pl
from jax.experimental.pallas import tpu as pltpu


def _round_up(x, m):
    return (x + m - 1) // m * m


# ----------------------------------------------------------------------------
# Pallas kernel: class head (Linear) + bbox head (3-layer MLP) + inverse
# sigmoid of the reference points + sigmoid + (optionally) cxcywh -> xyxy.
# ----------------------------------------------------------------------------
def _dethead_kernel(hs_ref, ref_ref,
                    wc_ref, bc_ref,
                    w1_ref, b1_ref, w2_ref, b2_ref, w3_ref, b3_ref,
                    cls_ref, box_ref, *, decode):
    x = hs_ref[...]                                   # (TR, D), compute dtype
    cdt = x.dtype

    # --- classification embed: Linear(d_model, C_pad), lane-dense output ----
    cls = jnp.dot(x, wc_ref[...], preferred_element_type=jnp.float32)
    cls_ref[...] = (cls + bc_ref[...]).astype(cls_ref.dtype)

    # --- bbox embed: MLP(d_model, d_model, 4, 3) = Lin-ReLU-Lin-ReLU-Lin ----
    h = jnp.dot(x, w1_ref[...], preferred_element_type=jnp.float32) + b1_ref[...]
    h = jnp.maximum(h, 0.0).astype(cdt)
    h = jnp.dot(h, w2_ref[...], preferred_element_type=jnp.float32) + b2_ref[...]
    h = jnp.maximum(h, 0.0).astype(cdt)
    delta = jnp.dot(h, w3_ref[...], preferred_element_type=jnp.float32)

    # --- inverse_sigmoid(reference), f32 elementwise (EUP for log/sigmoid) ---
    r = jnp.clip(ref_ref[...].astype(jnp.float32), 0.0, 1.0)        # (TR, 4)
    inv = jnp.log(jnp.maximum(r, 1e-5) / jnp.maximum(1.0 - r, 1e-5))

    coords = jax.nn.sigmoid(delta + (inv + b3_ref[...]))            # cxcywh

    if decode:
        # decode_bbox: (cx, cy, w, h) -> (x1, y1, x2, y2)
        cxcy = coords[:, 0:2]
        wh = coords[:, 2:4]
        coords = jnp.concatenate([cxcy - 0.5 * wh, cxcy + 0.5 * wh], axis=-1)

    box_ref[...] = coords.astype(box_ref.dtype)


# ----------------------------------------------------------------------------
# Wrapper around pallas_call (one parallel grid axis over row tiles).
# ----------------------------------------------------------------------------
def _pick_tile_rows(n_rows, requested):
    t = max(8, _round_up(min(requested, n_rows), 8))
    if n_rows > 8:
        # keep at least 2 grid steps so both v7x TensorCores get work
        t = min(t, _round_up(pl.cdiv(n_rows, 2), 8))
    return t


def _dethead_call(hs2d, ref2d, p, *, decode, tile_rows):
    out_dtype = jnp.float32
    R, D = hs2d.shape
    C_pad = p["wc"].shape[1]

    t = _pick_tile_rows(R, tile_rows)
    R_pad = _round_up(R, t)
    if R_pad != R:
        hs2d = jnp.pad(hs2d, ((0, R_pad - R), (0, 0)))
        ref2d = jnp.pad(ref2d, ((0, R_pad - R), (0, 0)))
    grid = (R_pad // t,)

    def full_spec(arr):
        shape = arr.shape
        return pl.BlockSpec(shape, lambda i, _n=len(shape): (0,) * _n)

    weights = (p["wc"], p["bc"], p["w1"], p["b1"],
               p["w2"], p["b2"], p["w3"], p["b3"])

    flops = 2 * R_pad * D * (C_pad + 2 * D + 4)
    bytes_accessed = (hs2d.size * hs2d.dtype.itemsize
                      + ref2d.size * ref2d.dtype.itemsize
                      + sum(w.size * w.dtype.itemsize for w in weights)
                      + R_pad * (C_pad + 4) * 4)
    cost = pl.CostEstimate(flops=flops, transcendentals=8 * R_pad,
                           bytes_accessed=bytes_accessed)

    kernel = functools.partial(_dethead_kernel, decode=decode)

    cls, box = pl.pallas_call(
        kernel,
        out_shape=(jax.ShapeDtypeStruct((R_pad, C_pad), out_dtype),
                   jax.ShapeDtypeStruct((R_pad, 4), out_dtype)),
        grid=grid,
        in_specs=[
            pl.BlockSpec((t, D), lambda i: (i, 0)),      # hidden states
            pl.BlockSpec((t, 4), lambda i: (i, 0)),      # reference points
        ] + [full_spec(w) for w in weights],
        out_specs=(pl.BlockSpec((t, C_pad), lambda i: (i, 0)),
                   pl.BlockSpec((t, 4), lambda i: (i, 0))),
        compiler_params=pltpu.CompilerParams(
            dimension_semantics=("parallel",),
            vmem_limit_bytes=48 * 1024 * 1024),
        cost_estimate=cost,
    )(hs2d, ref2d, *weights)
    return cls[:R], box[:R]


# ----------------------------------------------------------------------------
# Parameter prep: lane-pad the class head to a multiple of 128 and cast
# weights to the matmul compute dtype (biases stay f32).
# ----------------------------------------------------------------------------
def _prep_params(params, use_bf16):
    wdt = jnp.bfloat16 if use_bf16 else jnp.float32
    C = params["wc"].shape[1]
    C_pad = _round_up(C, 128)
    return {
        "wc": jnp.pad(params["wc"], ((0, 0), (0, C_pad - C))).astype(wdt),
        "bc": jnp.pad(params["bc"], ((0, 0), (0, C_pad - C))).astype(jnp.float32),
        "w1": params["w1"].astype(wdt),
        "b1": params["b1"].astype(jnp.float32),
        "w2": params["w2"].astype(wdt),
        "b2": params["b2"].astype(jnp.float32),
        "w3": params["w3"].astype(wdt),
        "b3": params["b3"].astype(jnp.float32),
    }


# ----------------------------------------------------------------------------
# DetectHead.forward
#   hs:        (L, B, Q, d_model)   decoder hidden states per layer
#   reference: (L+1, B, Q, 4)       sigmoid-space reference points
# ----------------------------------------------------------------------------
def detect_head_forward(params, hs, reference, multi_layer=False,
                        tile_rows=512, use_bf16=True):
    L, B, Q, D = hs.shape
    C = params["wc"].shape[1]
    cdt = jnp.bfloat16 if use_bf16 else jnp.float32
    p = _prep_params(params, use_bf16)

    if not multi_layer:
        hs2d = hs[-1].reshape(B * Q, D).astype(cdt)
        # NOTE: matches the PyTorch module exactly: reference[-2] is used for
        # the final layer (`reference` carries L+1 entries, initial ref first).
        ref2d = reference[-2].reshape(B * Q, 4).astype(jnp.float32)
        cls, box = _dethead_call(hs2d, ref2d, p, decode=True,
                                 tile_rows=tile_rows)
        return cls[:, :C].reshape(B, Q, C), box.reshape(B, Q, 4)

    # multi_layer: with_box_refine ties the same weights across all L layers,
    # so all layers are fused into a single pallas_call over L*B*Q rows.
    hs2d = hs.reshape(L * B * Q, D).astype(cdt)
    ref2d = reference[:L].reshape(L * B * Q, 4).astype(jnp.float32)
    cls, box = _dethead_call(hs2d, ref2d, p, decode=False, tile_rows=tile_rows)
    return cls[:, :C].reshape(L, B, Q, C), box.reshape(L, B, Q, 4)


# ----------------------------------------------------------------------------
# Pure-JAX f32 reference (mirrors the PyTorch forward) for validation.
# ----------------------------------------------------------------------------
def _reference_forward(params, hs, reference, multi_layer):
    def inv_sig(x):
        x = jnp.clip(x, 0.0, 1.0)
        return jnp.log(jnp.maximum(x, 1e-5) / jnp.maximum(1.0 - x, 1e-5))

    def mlp(x):
        h = jnp.maximum(x @ params["w1"] + params["b1"], 0.0)
        h = jnp.maximum(h @ params["w2"] + params["b2"], 0.0)
        return h @ params["w3"] + params["b3"]

    if not multi_layer:
        x = hs[-1]
        cls = x @ params["wc"] + params["bc"]
        coords = jax.nn.sigmoid(mlp(x) + inv_sig(reference[-2]))
        box = jnp.concatenate([coords[..., :2] - 0.5 * coords[..., 2:],
                               coords[..., :2] + 0.5 * coords[..., 2:]], axis=-1)
        return cls, box

    L = hs.shape[0]
    cls = hs @ params["wc"] + params["bc"]
    coords = jax.nn.sigmoid(mlp(hs) + inv_sig(reference[:L]))
    return cls, coords


# ----------------------------------------------------------------------------
# Deterministic parameter init (mirrors DetectHead.__init__ / init_weight()).
# ----------------------------------------------------------------------------
def init_params(key, d_model, num_classes):
    ks = jax.random.split(key, 5)

    def lin_w(k, fan_in, fan_out):
        bound = 1.0 / jnp.sqrt(float(fan_in))
        return jax.random.uniform(k, (fan_in, fan_out), jnp.float32, -bound, bound)

    def lin_b(k, fan_in, fan_out):
        bound = 1.0 / jnp.sqrt(float(fan_in))
        return jax.random.uniform(k, (1, fan_out), jnp.float32, -bound, bound)

    init_prob = 0.01
    bias_value = -jnp.log((1.0 - init_prob) / init_prob)   # class bias per init_weight

    return {
        # class_embed: Linear(d_model, num_classes); bias = -log((1-p)/p)
        "wc": lin_w(ks[0], d_model, num_classes),
        "bc": jnp.full((1, num_classes), bias_value, jnp.float32),
        # bbox_embed: MLP(d_model, d_model, 4, 3)
        "w1": lin_w(ks[1], d_model, d_model),
        "b1": lin_b(ks[2], d_model, d_model),
        "w2": lin_w(ks[3], d_model, d_model),
        "b2": lin_b(ks[4], d_model, d_model),
        # last MLP layer zero-initialized per init_weight()
        "w3": jnp.zeros((d_model, 4), jnp.float32),
        "b3": jnp.zeros((1, 4), jnp.float32),
    }


if __name__ == "__main__":
    key = jax.random.PRNGKey(0)
    d_model, num_classes = 32, 8
    L, B, Q = 3, 2, 16   # decoder layers, batch, queries

    k_p, k_hs, k_ref = jax.random.split(key, 3)
    params = init_params(k_p, d_model, num_classes)

    hs = jax.random.normal(k_hs, (L, B, Q, d_model), jnp.float32)
    reference = jax.nn.sigmoid(
        jax.random.normal(k_ref, (L + 1, B, Q, 4), jnp.float32))

    # single-layer path (final decoder layer + cxcywh -> xyxy decode)
    out_cls, out_box = detect_head_forward(params, hs, reference,
                                           multi_layer=False)
    # fused multi-layer path (with_box_refine, tied weights across layers)
    ml_cls, ml_box = detect_head_forward(params, hs, reference,
                                         multi_layer=True)
    jax.block_until_ready((out_cls, out_box, ml_cls, ml_box))

    assert out_cls.shape == (B, Q, num_classes)
    assert out_box.shape == (B, Q, 4)
    assert ml_cls.shape == (L, B, Q, num_classes)
    assert ml_box.shape == (L, B, Q, 4)

    # loose check against a pure-JAX f32 reference (kernel matmuls are bf16)
    ref_cls, ref_box = _reference_forward(params, hs, reference, False)
    ref_mcls, ref_mbox = _reference_forward(params, hs, reference, True)
    assert float(jnp.max(jnp.abs(out_cls - ref_cls))) < 1e-1
    assert float(jnp.max(jnp.abs(out_box - ref_box))) < 1e-3
    assert float(jnp.max(jnp.abs(ml_cls - ref_mcls))) < 1e-1
    assert float(jnp.max(jnp.abs(ml_box - ref_mbox))) < 1e-3

    print("KERNEL_OK")
</pallas_src>

<mosaic_0001>
module attributes {stable_mosaic.version = 11 : i64} {
  func.func @_dethead_kernel(%arg0: i32, %arg1: memref<16x32xbf16, #tpu.memory_space<vmem>>, %arg2: memref<16x4xf32, #tpu.memory_space<vmem>>, %arg3: memref<32x128xbf16, #tpu.memory_space<vmem>>, %arg4: memref<1x128xf32, #tpu.memory_space<vmem>>, %arg5: memref<32x32xbf16, #tpu.memory_space<vmem>>, %arg6: memref<1x32xf32, #tpu.memory_space<vmem>>, %arg7: memref<32x32xbf16, #tpu.memory_space<vmem>>, %arg8: memref<1x32xf32, #tpu.memory_space<vmem>>, %arg9: memref<32x4xbf16, #tpu.memory_space<vmem>>, %arg10: memref<1x4xf32, #tpu.memory_space<vmem>>, %arg11: memref<16x128xf32, #tpu.memory_space<vmem>>, %arg12: memref<16x4xf32, #tpu.memory_space<vmem>>) attributes {dimension_semantics = [#tpu.dimension_semantics<parallel>], iteration_bounds = array<i64: 2>, scalar_prefetch = 0 : i64, scratch_operands = 0 : i64, tpu.core_type = #tpu.core_type<tc>, window_params = [{transform_indices = @transform_0, window_bounds = array<i64: 16, 32>}, {transform_indices = @transform_1, window_bounds = array<i64: 16, 4>}, {pipeline_mode = #tpu.pipeline_mode<synchronous>, transform_indices = @transform_2, window_bounds = array<i64: 32, 128>}, {pipeline_mode = #tpu.pipeline_mode<synchronous>, transform_indices = @transform_3, window_bounds = array<i64: 1, 128>}, {pipeline_mode = #tpu.pipeline_mode<synchronous>, transform_indices = @transform_4, window_bounds = array<i64: 32, 32>}, {pipeline_mode = #tpu.pipeline_mode<synchronous>, transform_indices = @transform_5, window_bounds = array<i64: 1, 32>}, {pipeline_mode = #tpu.pipeline_mode<synchronous>, transform_indices = @transform_6, window_bounds = array<i64: 32, 32>}, {pipeline_mode = #tpu.pipeline_mode<synchronous>, transform_indices = @transform_7, window_bounds = array<i64: 1, 32>}, {pipeline_mode = #tpu.pipeline_mode<synchronous>, transform_indices = @transform_8, window_bounds = array<i64: 32, 4>}, {pipeline_mode = #tpu.pipeline_mode<synchronous>, transform_indices = @transform_9, window_bounds = array<i64: 1, 4>}, {transform_indices = @transform_10, window_bounds = array<i64: 16, 128>}, {transform_indices = @transform_11, window_bounds = array<i64: 16, 4>}]} {
    %c0 = arith.constant 0 : index
    %c0_0 = arith.constant 0 : index
    %0 = vector.load %arg1[%c0, %c0_0] : memref<16x32xbf16, #tpu.memory_space<vmem>>, vector<16x32xbf16>
    %c0_1 = arith.constant 0 : index
    %c0_2 = arith.constant 0 : index
    %1 = vector.load %arg3[%c0_1, %c0_2] : memref<32x128xbf16, #tpu.memory_space<vmem>>, vector<32x128xbf16>
    %cst = arith.constant dense<0.000000e+00> : vector<16x128xf32>
    %2 = tpu.matmul %0, %1, %cst {dimension_numbers = #tpu.dot_dimension_numbers<[1], [0], [0], [1], [0, 0, 1, 1], [], []>} : vector<16x32xbf16>, vector<32x128xbf16>, vector<16x128xf32> -> vector<16x128xf32>
    %c0_3 = arith.constant 0 : index
    %c0_4 = arith.constant 0 : index
    %3 = vector.load %arg4[%c0_3, %c0_4] : memref<1x128xf32, #tpu.memory_space<vmem>>, vector<1x128xf32>
    %4 = vector.broadcast %3 : vector<1x128xf32> to vector<16x128xf32>
    %5 = arith.addf %2, %4 : vector<16x128xf32>
    %c0_5 = arith.constant 0 : index
    %c0_6 = arith.constant 0 : index
    %6 = vector.load %arg11[%c0_5, %c0_6] : memref<16x128xf32, #tpu.memory_space<vmem>>, vector<16x128xf32>
    tpu.vector_store %arg11[%c0_5, %c0_6], %5 {strides = array<i32>} : memref<16x128xf32, #tpu.memory_space<vmem>>, vector<16x128xf32>,
    %c0_7 = arith.constant 0 : index
    %c0_8 = arith.constant 0 : index
    %7 = vector.load %arg5[%c0_7, %c0_8] : memref<32x32xbf16, #tpu.memory_space<vmem>>, vector<32x32xbf16>
    %cst_9 = arith.constant dense<0.000000e+00> : vector<16x32xf32>
    %8 = tpu.matmul %0, %7, %cst_9 {dimension_numbers = #tpu.dot_dimension_numbers<[1], [0], [0], [1], [0, 0, 1, 1], [], []>} : vector<16x32xbf16>, vector<32x32xbf16>, vector<16x32xf32> -> vector<16x32xf32>
    %c0_10 = arith.constant 0 : index
    %c0_11 = arith.constant 0 : index
    %9 = vector.load %arg6[%c0_10, %c0_11] : memref<1x32xf32, #tpu.memory_space<vmem>>, vector<1x32xf32>
    %10 = vector.broadcast %9 : vector<1x32xf32> to vector<16x32xf32>
    %11 = arith.addf %8, %10 : vector<16x32xf32>
    %cst_12 = arith.constant 0.000000e+00 : f32
    %12 = vector.broadcast %cst_12 : f32 to vector<16x32xf32>
    %13 = arith.maximumf %11, %12 : vector<16x32xf32>
    %14 = arith.truncf %13 : vector<16x32xf32> to vector<16x32xbf16>
    %c0_13 = arith.constant 0 : index
    %c0_14 = arith.constant 0 : index
    %15 = vector.load %arg7[%c0_13, %c0_14] : memref<32x32xbf16, #tpu.memory_space<vmem>>, vector<32x32xbf16>
    %cst_15 = arith.constant dense<0.000000e+00> : vector<16x32xf32>
    %16 = tpu.matmul %14, %15, %cst_15 {dimension_numbers = #tpu.dot_dimension_numbers<[1], [0], [0], [1], [0, 0, 1, 1], [], []>} : vector<16x32xbf16>, vector<32x32xbf16>, vector<16x32xf32> -> vector<16x32xf32>
    %c0_16 = arith.constant 0 : index
    %c0_17 = arith.constant 0 : index
    %17 = vector.load %arg8[%c0_16, %c0_17] : memref<1x32xf32, #tpu.memory_space<vmem>>, vector<1x32xf32>
    %18 = vector.broadcast %17 : vector<1x32xf32> to vector<16x32xf32>
    %19 = arith.addf %16, %18 : vector<16x32xf32>
    %cst_18 = arith.constant 0.000000e+00 : f32
    %20 = vector.broadcast %cst_18 : f32 to vector<16x32xf32>
    %21 = arith.maximumf %19, %20 : vector<16x32xf32>
    %22 = arith.truncf %21 : vector<16x32xf32> to vector<16x32xbf16>
    %c0_19 = arith.constant 0 : index
    %c0_20 = arith.constant 0 : index
    %23 = vector.load %arg9[%c0_19, %c0_20] : memref<32x4xbf16, #tpu.memory_space<vmem>>, vector<32x4xbf16>
    %cst_21 = arith.constant dense<0.000000e+00> : vector<16x4xf32>
    %24 = tpu.matmul %22, %23, %cst_21 {dimension_numbers = #tpu.dot_dimension_numbers<[1], [0], [0], [1], [0, 0, 1, 1], [], []>} : vector<16x32xbf16>, vector<32x4xbf16>, vector<16x4xf32> -> vector<16x4xf32>
    %c0_22 = arith.constant 0 : index
    %c0_23 = arith.constant 0 : index
    %25 = vector.load %arg2[%c0_22, %c0_23] : memref<16x4xf32, #tpu.memory_space<vmem>>, vector<16x4xf32>
    %cst_24 = arith.constant 0.000000e+00 : f32
    %cst_25 = arith.constant 1.000000e+00 : f32
    %26 = vector.broadcast %cst_24 : f32 to vector<16x4xf32>
    %27 = arith.maximumf %26, %25 : vector<16x4xf32>
    %28 = vector.broadcast %cst_25 : f32 to vector<16x4xf32>
    %29 = arith.minimumf %28, %27 : vector<16x4xf32>
    %cst_26 = arith.constant 9.99999974E-6 : f32
    %30 = vector.broadcast %cst_26 : f32 to vector<16x4xf32>
    %31 = arith.maximumf %29, %30 : vector<16x4xf32>
    %cst_27 = arith.constant 1.000000e+00 : f32
    %32 = vector.broadcast %cst_27 : f32 to vector<16x4xf32>
    %33 = arith.subf %32, %29 : vector<16x4xf32>
    %cst_28 = arith.constant 9.99999974E-6 : f32
    %34 = vector.broadcast %cst_28 : f32 to vector<16x4xf32>
    %35 = arith.maximumf %33, %34 : vector<16x4xf32>
    %36 = arith.divf %31, %35 : vector<16x4xf32>
    %37 = math.log %36 : vector<16x4xf32>
    %c0_29 = arith.constant 0 : index
    %c0_30 = arith.constant 0 : index
    %38 = vector.load %arg10[%c0_29, %c0_30] : memref<1x4xf32, #tpu.memory_space<vmem>>, vector<1x4xf32>
    %39 = vector.broadcast %38 : vector<1x4xf32> to vector<16x4xf32>
    %40 = arith.addf %37, %39 : vector<16x4xf32>
    %41 = arith.addf %24, %40 : vector<16x4xf32>
    %42 = arith.negf %41 : vector<16x4xf32>
    %43 = math.exp %42 : vector<16x4xf32>
    %cst_31 = arith.constant 1.000000e+00 : f32
    %44 = vector.broadcast %cst_31 : f32 to vector<16x4xf32>
    %45 = arith.addf %44, %43 : vector<16x4xf32>
    %46 = arith.divf %44, %45 : vector<16x4xf32>
    %47 = vector.extract_strided_slice %46 {offsets = [0, 0], sizes = [16, 2], strides = [1, 1]} : vector<16x4xf32> to vector<16x2xf32>
    %48 = vector.extract_strided_slice %46 {offsets = [0, 2], sizes = [16, 2], strides = [1, 1]} : vector<16x4xf32> to vector<16x2xf32>
    %cst_32 = arith.constant 5.000000e-01 : f32
    %49 = vector.broadcast %cst_32 : f32 to vector<16x2xf32>
    %50 = arith.mulf %49, %48 : vector<16x2xf32>
    %51 = arith.subf %47, %50 : vector<16x2xf32>
    %cst_33 = arith.constant 5.000000e-01 : f32
    %52 = vector.broadcast %cst_33 : f32 to vector<16x2xf32>
    %53 = arith.mulf %52, %48 : vector<16x2xf32>
    %54 = arith.addf %47, %53 : vector<16x2xf32>
    %55 = tpu.concatenate %51, %54 in 1 : vector<16x2xf32>, vector<16x2xf32> -> vector<16x4xf32>
    %c0_34 = arith.constant 0 : index
    %c0_35 = arith.constant 0 : index
    %56 = vector.load %arg12[%c0_34, %c0_35] : memref<16x4xf32, #tpu.memory_space<vmem>>, vector<16x4xf32>
    tpu.vector_store %arg12[%c0_34, %c0_35], %55 {strides = array<i32>} : memref<16x4xf32, #tpu.memory_space<vmem>>, vector<16x4xf32>,
    return
  }
  func.func @transform_0(%arg0: i32) -> (i32, i32) {
    %c0_i32 = arith.constant 0 : i32
    %c0_i32_0 = arith.constant 0 : i32
    return %arg0, %c0_i32 : i32, i32
  }
  func.func @transform_1(%arg0: i32) -> (i32, i32) {
    %c0_i32 = arith.constant 0 : i32
    %c0_i32_0 = arith.constant 0 : i32
    return %arg0, %c0_i32 : i32, i32
  }
  func.func @transform_2(%arg0: i32) -> (i32, i32) {
    %c0_i32 = arith.constant 0 : i32
    %c0_i32_0 = arith.constant 0 : i32
    %c0_i32_1 = arith.constant 0 : i32
    return %c0_i32, %c0_i32_0 : i32, i32
  }
  func.func @transform_3(%arg0: i32) -> (i32, i32) {
    %c0_i32 = arith.constant 0 : i32
    %c0_i32_0 = arith.constant 0 : i32
    %c0_i32_1 = arith.constant 0 : i32
    return %c0_i32, %c0_i32_0 : i32, i32
  }
  func.func @transform_4(%arg0: i32) -> (i32, i32) {
    %c0_i32 = arith.constant 0 : i32
    %c0_i32_0 = arith.constant 0 : i32
    %c0_i32_1 = arith.constant 0 : i32
    return %c0_i32, %c0_i32_0 : i32, i32
  }
  func.func @transform_5(%arg0: i32) -> (i32, i32) {
    %c0_i32 = arith.constant 0 : i32
    %c0_i32_0 = arith.constant 0 : i32
    %c0_i32_1 = arith.constant 0 : i32
    return %c0_i32, %c0_i32_0 : i32, i32
  }
  func.func @transform_6(%arg0: i32) -> (i32, i32) {
    %c0_i32 = arith.constant 0 : i32
    %c0_i32_0 = arith.constant 0 : i32
    %c0_i32_1 = arith.constant 0 : i32
    return %c0_i32, %c0_i32_0 : i32, i32
  }
  func.func @transform_7(%arg0: i32) -> (i32, i32) {
    %c0_i32 = arith.constant 0 : i32
    %c0_i32_0 = arith.constant 0 : i32
    %c0_i32_1 = arith.constant 0 : i32
    return %c0_i32, %c0_i32_0 : i32, i32
  }
  func.func @transform_8(%arg0: i32) -> (i32, i32) {
    %c0_i32 = arith.constant 0 : i32
    %c0_i32_0 = arith.constant 0 : i32
    %c0_i32_1 = arith.constant 0 : i32
    return %c0_i32, %c0_i32_0 : i32, i32
  }
  func.func @transform_9(%arg0: i32) -> (i32, i32) {
    %c0_i32 = arith.constant 0 : i32
    %c0_i32_0 = arith.constant 0 : i32
    %c0_i32_1 = arith.constant 0 : i32
    return %c0_i32, %c0_i32_0 : i32, i32
  }
  func.func @transform_10(%arg0: i32) -> (i32, i32) {
    %c0_i32 = arith.constant 0 : i32
    %c0_i32_0 = arith.constant 0 : i32
    return %arg0, %c0_i32 : i32, i32
  }
  func.func @transform_11(%arg0: i32) -> (i32, i32) {
    %c0_i32 = arith.constant 0 : i32
    %c0_i32_0 = arith.constant 0 : i32
    return %arg0, %c0_i32 : i32, i32
  }
}

</mosaic_0001>

<bundles_post_ra>
// kernel: tpu_custom_call.1
= control target key start
LH: loop header
LB: loop body
LE: loop exit
PB: predicated region body
PF: predicated region fallthrough
CT: control target
= control target key end

     0   :  { %s1340_s0 = inlined_call_operand.vmem [shape: bf16[32,32], index: 0, kind: input, shape index: {}]   ;;  %s1341_s1 = inlined_call_operand.vmem [shape: f32[32,4], index: 1, kind: input, shape index: {}]   ;;  %s1342_s2 = inlined_call_operand.vmem [shape: bf16[32,128], index: 2, kind: input, shape index: {}]   ;;  %s1343_s3 = inlined_call_operand.vmem [shape: f32[1,128], index: 3, kind: input, shape index: {}]   ;;  %s1344_s4 = inlined_call_operand.vmem [shape: bf16[32,32], index: 4, kind: input, shape index: {}]   ;;  %s1345_s5 = inlined_call_operand.vmem [shape: f32[1,32], index: 5, kind: input, shape index: {}]   ;;  %s1346_s6 = inlined_call_operand.vmem [shape: bf16[32,32], index: 6, kind: input, shape index: {}]   ;;  %s1347_s7 = inlined_call_operand.vmem [shape: f32[1,32], index: 7, kind: input, shape index: {}]   ;;  %s1348_s8 = inlined_call_operand.vmem [shape: bf16[32,4], index: 8, kind: input, shape index: {}]   ;;  %s1349_s9 = inlined_call_operand.vmem [shape: f32[1,4], index: 9, kind: input, shape index: {}]   ;;  %s1350_s10 = inlined_call_operand.hbm [shape: f32[32,128], index: 10, kind: output, shape index: {0}]   ;;  %s1351_s11 = inlined_call_operand.vmem [shape: f32[32,4], index: 11, kind: output, shape index: {1}]  }
   0x1   :  { %1353 = sst [smem:[#allocation5_spill]] %s1340_s0 }
   0x2   :  { %1354 = sst [smem:[#allocation6_spill]] %s1341_s1 }
   0x3   :  { %17 = vsyncpa [#allocation3], 0 }
   0x4   :  { %19 = vsyncpa [#allocation3 + $0x1], 0  ;;  %s1171_s17 = smov 0   ;;  %s1173_s18 = smov 0  }
   0x5   :  { %s1175_s19 = smov 0   ;;  %s1177_s20 = smov 0  }
   0x6 LB: > { %s1192_s21 = sadd.s32 4294967295, %s1102_s20   ;;  %s890_s22 = sadd.s32 4294967294, %s1102_s20   ;;  %s1102_s20 = sphi %s1177_s20, %s1363_s20   ;;  %s1098_s19 = sphi %s1175_s19, %s1362_s19   ;;  %s1094_s18 = sphi %s1173_s18, %s1361_s18   ;;  %s1090_s17 = sphi %s1171_s17, %s1360_s17  }
   0x7   : > { %s1196_s23 = sadd.s32 1, %s1102_s20   ;;  %s252_s24 = sadd.s32 1, %s1098_s19 }
   0x8   : > { %s249_s25 = ssub.s32 %s1102_s20, %s1196_s23  ;;  %p262_p0 = scmp.ne.s32.totalorder %s1098_s19, %s1094_s18 }
   0x9   : > { %p250_p1 = scmp.eq.s32.totalorder %s249_s25, 0  ;;  %p263_p2 = scmp.eq.s32.totalorder %s1192_s21, 1 }
   0xa   : > { %p268_p3 = scmp.ne.s32.totalorder %s1094_s18, %s1090_s17  ;;  %p269_p4 = scmp.eq.s32.totalorder %s890_s22, 1 }
   0xb   : > { %s1207_s26 = scalar_select %p250_p1, %s1098_s19, %s252_s24  }
   0xc   : > { %p1209_p5 = por %p263_p2, %p262_p0  ;;  %p1213_p6 = por %p269_p4, %p268_p3 }
   0xd   : > { %p893_p7 = scmp.ge.s32.totalorder %s1102_s20, 1  ;;  %p355_p8 = scmp.lt.s32.totalorder %s1102_s20, 3 }
   0xf   : > { %p356_p9 = pnand %p893_p7, %p355_p8 }
  0x10   : > { %v1015_v0 = vld [vmem:[%s1344_s4] sm:$0xff] (!%p356_p9)   ;;  %v1104_v1 = vmov (!%p356_p9), 0.0   ;;  %v1016_v2 = vld [vmem:[%s1344_s4 + $0x8] sm:$0xff] (!%p356_p9)   ;;  %vm1105_vm0 = vmmov (!%p356_p9), 0   ;;  %s895_s14 = sshll.u32 (!%p356_p9), %s1192_s21, 1  ;;  %s1357_s0 = sld [smem:[#allocation5_spill]] (!%p356_p9) }
  0x11   : > { %359 = sbr.rel (%p356_p9) target bundleno = 948 (0x3b4), region = 60  ;;  %946 = vmatprep.subr.bf16.mxu1 (!%p356_p9), %v1104_v1  ;;  %938 = vmatprep.subr.bf16.mxu0 (!%p356_p9), %v1104_v1  ;;  %p406_p10 = scmp.lt.s32.totalorder (!%p356_p9), %s895_s14, 3  ;;  %v1018_v3 = vld [vmem:[%s1342_s2] sm:$0xff] (!%p356_p9)   ;;  %v1019_v4 = vld [vmem:[%s1342_s2 + $0x8] sm:$0xff] (!%p356_p9)   ;;  %vm455_vm1 = vcmask (!%p356_p9), 261120  }
  0x12   : > { %947 = vmatpush3.bf16.msra.mxu1 (!%p356_p9), %v1015_v0  ;;  %950 = vmatprep.mubr.msk.bf16.mxu1 (!%p356_p9), %vm1105_vm0, %v1104_v1  ;;  %v1020_v6 = vld [vmem:[%s1346_s6] sm:$0xff] (!%p356_p9)   ;;  %v1021_v7 = vld [vmem:[%s1346_s6 + $0x8] sm:$0xff] (!%p356_p9)   ;;  %s395_s24 = sand.u32 (!%p356_p9), 1, %s1094_s18   ;;  %s1358_s1 = sld [smem:[#allocation6_spill]] (!%p356_p9) }
  0x13   : > { %948 = vmatprep.subr.bf16.mxu1 (!%p356_p9), %v1104_v1  ;;  %942 = vmatprep.mubr.msk.bf16.mxu0 (!%p356_p9), %vm1105_vm0, %v1104_v1  ;;  %v906_v8 = vld [vmem:[%s1345_s5] ss:$0 sm:$0xff] (!%p356_p9)  ;;  %s894_s30 = sshll.u32 (!%p356_p9), %s395_s24, 4  ;;  %v1023_v26 = vld [vmem:[%s1348_s8 + $0x8] sm:$0xff] (!%p356_p9)   ;;  %s1294_s22 = scalar_lea.sflag (!%p356_p9), [#allocation3], %s395_s24 }
  0x14   : > { %939 = vmatpush3.bf16.msra.mxu0 (!%p356_p9), %v1018_v3  ;;  %v901_v9 = vld [vmem:[%s1343_s3] ss:$0 sm:$0xff] (!%p356_p9)  ;;  %s1259_s13 = scalar_lea.vmem (!%p356_p9), [#allocation2], %s894_s30 }
  0x15   : > { %940 = vmatprep.subr.bf16.mxu0 (!%p356_p9), %v1104_v1  ;;  %v1022_v25 = vld [vmem:[%s1348_s8] sm:$0xff] (!%p356_p9)   ;;  %s787_s29 = sshll.u32 (!%p356_p9), %s1259_s13, 4  ;;  %s1284_s29 = int_to_ptr.vmem [resolvable:$true] %s787_s29 }
  0x16   : > { %949 = vmatpush3.bf16.msra.mxu1 (!%p356_p9), %v1016_v2  ;;  %v910_v27 = vld [vmem:[%s1347_s7] ss:$0 sm:$0xff] (!%p356_p9) }
  0x17   : > { %962 = vmatprep.subr.bf16.mxu1 (!%p356_p9), %v1104_v1  ;;  %v914_v56 = vld [vmem:[%s1349_s9] ss:$0 sm:$0xff] (!%p356_p9) }
  0x18   : > { %s1365_s14 = smov (!%p406_p10, %s895_s14), 3  ;;  %941 = vmatpush3.bf16.msra.mxu0 %v1019_v4 }
  0x19   : > { %s896_s25 = sshll.u32 %s1365_s14, 2  ;;  %954 = vmatprep.subr.bf16.mxu0 %v1104_v1  ;;  %s1352_s30 = sshll.u32 %s1365_s14, 3 }
  0x1a   : > { %s409_s12 = scalar_lea.vmem %s1357_s0, %s896_s25  ;;  %s415_s15 = scalar_lea.vmem %s1358_s1, %s1352_s30 }
  0x1b   : > { %v1017_v5 = vld [vmem:[%s409_s12] sm:$0xff]   ;;  %v644_v38 = vld [vmem:[%s415_s15 + $0x8] sm:$0xff]  ;;  %s1106_s25 = smov 126   ;;  %s925_s12 = sshll.u32 %s1192_s21, 8 }
  0x1c   : > { %951 = vmatmul.mubr.msk.bf16.vlgmr.msra.gmra.mrb[0].mxu1 %vm455_vm1, %v1017_v5  ;;  %943 = vmatmul.mubr.msk.bf16.vlgmr.msra.gmra.mrb[0].mxu0 %vm455_vm1, %v1017_v5  ;;  %v643_v37 = vld [vmem:[%s415_s15] sm:$0xff]  ;;  %v646_v40 = vmax.f32 %v644_v38, 0.0  ;;  %s1290_s16 = scalar_lea.hbm %s1350_s10, %s925_s12  ;;  %s1040_s30 = scalar_lea.vmem %s1284_s29, 256 }
  0x1d   : > { %966 = vmatprep.mubr.msk.bf16.mxu1 %vm1105_vm0, %v1104_v1  ;;  %958 = vmatprep.mubr.msk.bf16.mxu0 %vm1105_vm0, %v1104_v1  ;;  %v645_v39 = vmax.f32 %v643_v37, 0.0  ;;  %p1041_p11 = scmp.ne.s32.totalorder %s1284_s29, %s1040_s30 }
  0x1e   : > { %955 = vmatpush3.bf16.msra.mxu0 %v1020_v6  ;;  %963 = vmatpush3.bf16.msra.mxu1 %v1022_v25  ;;  %v648_v42 = vmin.f32 %v646_v40, 1.0 }
  0x1f   : > { %956 = vmatprep.subr.bf16.mxu0 %v1104_v1  ;;  %964 = vmatprep.subr.bf16.mxu1 %v1104_v1  ;;  %v647_v41 = vmin.f32 %v645_v39, 1.0  ;;  %p1042_p12 = pnand %p1041_p11, %p1209_p5 }
  0x20   : > { %v652_v44 = vsub.f32 1.0, %v648_v42  ;;  %v650_v49 = vmax.f32 %v648_v42, 1e-05 }
  0x21   : > { %v651_v43 = vsub.f32 1.0, %v647_v41  ;;  %v649_v47 = vmax.f32 %v647_v41, 1e-05  ;;  %p1043_p13 = pneg %p1042_p12 }
  0x22   : > { %957 = vmatpush3.bf16.msra.mxu0 %v1021_v7  ;;  %965 = vmatpush3.bf16.msra.mxu1 %v1023_v26  ;;  %v654_v46 = vmax.f32 %v652_v44, 1e-05 }
  0x23   : > { %v653_v45 = vmax.f32 %v651_v43, 1e-05 }
  0x25   : > { %1024 = vrcp.f32 %v653_v45 }
  0x26   : > { %1026 = vrcp.f32 %v654_v46 }
  0x2f   : > { %v1025_v48 = vpop.eup %1024 }
  0x30   : > { %v1027_v50 = vpop.eup %1026  ;;  %v656_v51 = vmul.f32 %v1025_v48, %v649_v47 }
  0x31   : > { %v658_v52 = vmul.f32 %v1027_v50, %v650_v49 }
  0x32   : > { %1028 = vlog2.f32 %v656_v51 }
  0x33   : > { %1030 = vlog2.f32 %v658_v52 }
  0x3c   : > { %v1029_v53 = vpop.eup %1028 }
  0x3d   : > { %v1031_v54 = vpop.eup %1030  ;;  %v660_v55 = vmul.f32 0.6931472, %v1029_v53 }
  0x3e   : > { %v662_v57 = vmul.f32 0.6931472, %v1031_v54 }
  0x3f   : > { %v670_v58 = vadd.f32 %v914_v56, %v660_v55 }
  0x40   : > { %v671_v59 = vadd.f32 %v914_v56, %v662_v57 }
  0xef   : > { %v559_v10 = vpop.f32.mrb[0].mxu1  ;;  %v493_v13 = vpop.f32.mrb[0].mxu0 }
  0xf0   : > { %v560_v11 = vadd.f32 %v906_v8, %v559_v10  ;;  %v952_v12 = vpop.f32.mrb[1].mxu1  ;;  %v494_v15 = vadd.f32 %v901_v9, %v493_v13  ;;  %v944_v16 = vpop.f32.mrb[1].mxu0 }
  0xf1   : > { %v562_v14 = vpop.f32.mrb[2].mxu1  ;;  %v496_v19 = vpop.f32.mrb[2].mxu0 }
  0xf2   : > { %v563_v17 = vadd.f32 %v906_v8, %v562_v14  ;;  %v953_v18 = vpop.f32.mrb[3].mxu1  ;;  %500 = vst [vmem:[%s1259_s13] sm:$0xff] %v494_v15  ;;  %v497_v20 = vadd.f32 %v901_v9, %v496_v19  ;;  %v945_v21 = vpop.f32.mrb[3].mxu0  ;;  %v566_v22 = vmax.f32 %v560_v11, 0.0 }
  0xf4   : > { %v567_v23 = vmax.f32 %v563_v17, 0.0  ;;  %501 = vst [vmem:[%s1259_s13 + $0x8] sm:$0xff] %v497_v20  ;;  %s1107_s13 = smov [#allocation2]  }
  0xf6   : > { %v568_v24 = vpack.c.bf16 %v567_v23, %v566_v22 }
  0xf8   : > { %959 = vmatmul.mubr.msk.bf16.vlgmr.msra.gmra.mrb[4].mxu0 %vm455_vm1, %v568_v24 }
 0x1cb   : > { %v629_v28 = vpop.f32.mrb[4].mxu0 }
 0x1cc   : > { %v630_v29 = vadd.f32 %v910_v27, %v629_v28  ;;  %v960_v30 = vpop.f32.mrb[5].mxu0 }
 0x1cd   : > { %v632_v31 = vpop.f32.mrb[6].mxu0 }
 0x1ce   : > { %v633_v32 = vadd.f32 %v910_v27, %v632_v31  ;;  %v961_v33 = vpop.f32.mrb[7].mxu0  ;;  %v636_v34 = vmax.f32 %v630_v29, 0.0 }
 0x1d0   : > { %v637_v35 = vmax.f32 %v633_v32, 0.0 }
 0x1d2   : > { %v638_v36 = vpack.c.bf16 %v637_v35, %v636_v34 }
 0x1d4   : > { %967 = vmatmul.mubr.msk.bf16.vlgmr.msra.gmra.mrb[4].mxu1 %vm455_vm1, %v638_v36 }
 0x2a7   : > { %v721_v60 = vpop.f32.mrb[4].mxu1 }
 0x2a8   : > { %v722_v61 = vadd.f32 %v721_v60, %v670_v58  ;;  %v968_v62 = vpop.f32.mrb[5].mxu1 }
 0x2a9   : > { %v724_v63 = vpop.f32.mrb[6].mxu1 }
 0x2aa   : > { %v918_v0 = vmul.f32 -1.442695, %v722_v61  ;;  %v725_v1 = vadd.f32 %v724_v63, %v671_v59  ;;  %v969_v2 = vpop.f32.mrb[7].mxu1 }
 0x2ac   : > { %1032 = vpow2.f32 %v918_v0  ;;  %v919_v3 = vmul.f32 -1.442695, %v725_v1 }
 0x2ae   : > { %1034 = vpow2.f32 %v919_v3 }
 0x2b6   : > { %v1033_v4 = vpop.eup %1032 }
 0x2b7   : > { %v734_v5 = vadd.f32 1.0, %v1033_v4 }
 0x2b8   : > { %v1035_v6 = vpop.eup %1034 }
 0x2b9   : > { %1036 = vrcp.f32 %v734_v5  ;;  %v735_v7 = vadd.f32 1.0, %v1035_v6 }
 0x2bb   : > { %1038 = vrcp.f32 %v735_v7 }
 0x2c3   : > { %v1037_v8 = vpop.eup %1036 }
 0x2c4   : > { %v740_v9 = vmul.f32 0.5, %v1037_v8 }
 0x2c5   : > { %v1039_v10 = vpop.eup %1038 }
 0x2c6   : > { %744 = vrot.lane.b32.xlu0 %v740_v9, %s1106_s25  ;;  %v741_v11 = vmul.f32 0.5, %v1039_v10 }
 0x2ca   : > { %746 = vrot.lane.b32.xlu0 %v741_v11, %s1106_s25  ;;  %s1044_s25 = sshll.u32 %s1107_s13, 4  ;;  %s1045_s25 = int_to_ptr.vmem [resolvable:$false] %s1044_s25 }
 0x2cb   : > { %s1046_s1 = scalar_lea.vmem %s1045_s25, 512  ;;  %p1047_p0 = scmp.lt.s32.totalorder %s1284_s29, %s1045_s25 }
 0x2cc   : > { %p1048_p1 = scmp.lt.s32.totalorder %s1046_s1, %s1040_s30 }
 0x2ce   : > { %p1049_p2 = por %p1048_p1, %p1047_p0 }
 0x2d0   : > { %p1050_p3 = pnand %p1049_p2, %p1043_p13 }
 0x2d2   : > { %1053 = shalt.err (!%p1050_p3)
}
 0x2d3   : > { %s1054_s21 = scalar_lea.hbm %s1290_s16, 256  ;;  %s1058_s0 = scalar_lea.hbm %s1350_s10, 512 }
 0x2d4   : > { %p1055_p4 = scmp.ne.s32.totalorder %s1290_s16, %s1054_s21  ;;  %p1059_p9 = scmp.lt.u32.totalorder %s1290_s16, %s1350_s10 }
 0x2d5   : > { %p1060_p10 = scmp.lt.u32.totalorder %s1058_s0, %s1054_s21  ;;  %p1062_p12 = scmp.lt.u32.totalorder %s1054_s21, %s1290_s16 }
 0x2d6   : > { %p1056_p7 = pnand %p1055_p4, %p1209_p5 }
 0x2d7   : > { %p1061_p11 = por %p1060_p10, %p1059_p9 }
 0x2d8   : > { %p1057_p8 = pneg %p1056_p7 }
 0x2d9   : > { %p1063_p13 = por %p1062_p12, %p1061_p11 }
 0x2db   : > { %p1064_p0 = pnand %p1063_p13, %p1057_p8 }
 0x2dd   : > { %1067 = shalt.err (!%p1064_p0)
}
 0x2de   : > { %s1108_s1 = smov 128   ;;  %s1109_s30 = smov 8   ;;  %vm762_vm2 = vcmask 15360   ;;  %vm765_vm3 = vcmask 31744  }
 0x2df   : > { %970 = dma.vmem_to_hbm [thread:$0]  (%p1209_p5), %s1284_s29, 256, %s1290_s16, %s1294_s22, %s1108_s1, %s1108_s1, %s1109_s30  }
 0x2e0   : > { %s1110_s25 = smov 2   ;;  %s1359_s21 = sshll.u32 %s1365_s14, 3 }
 0x2e1   : > { %s422_s0 = scalar_lea.vmem %s1351_s11, %s1359_s21 }
 0x338   : > { %v745_v12 = vpop.permute.xlu0 %744 }
 0x339   : > { %v752_v13 = vadd.f32 %v1037_v8, %v745_v12  ;;  %v750_v16 = vsub.f32 %v1037_v8, %v745_v12 }
 0x33b   : > { %756 = vrot.lane.b32.xlu1 %v752_v13, %s1110_s25 }
 0x33c   : > { %v747_v14 = vpop.permute.xlu0 %746 }
 0x33d   : > { %v753_v15 = vadd.f32 %v1039_v10, %v747_v14  ;;  %v751_v19 = vsub.f32 %v1039_v10, %v747_v14 }
 0x33f   : > { %758 = vrot.lane.b32.xlu1 %v753_v15, %s1110_s25 }
 0x3ad   : > { %v757_v17 = vpop.permute.xlu1 %756 }
 0x3ae   : > { %v763_v18 = vsel %vm762_vm2, %v750_v16, %v757_v17 }
 0x3af   : > { %766 = vst.msk [vmem:[%s422_s0] sm:$0xff] %vm765_vm3, %v763_v18 }
 0x3b1   : > { %v759_v20 = vpop.permute.xlu1 %758 }
 0x3b2   : > { %v764_v21 = vsel %vm762_vm2, %v751_v19, %v759_v20 }
 0x3b3   : > { %767 = vst.msk [vmem:[%s422_s0 + $0x8] sm:$0xff] %vm765_vm3, %v764_v21 }
 0x3b4 PF: > { %p976_p5 = scmp.ge.s32.totalorder %s1102_s20, 2  ;;  %s806_s27 = sand.u32 1, %s1090_s17  }
 0x3b5   : > { %s807_s14 = scalar_lea.sflag [#allocation3], %s806_s27 }
 0x3b6   : > { %p973_p1 = pnand %p976_p5, %p1213_p6 }
 0x3b8   : > { %1085 = dma.done.wait (!%p973_p1), %s807_s14, 256  }
 0x3b9   : > { %1087 = vsyncadd (!%p973_p1), %s807_s14, 4294967040  ;;  %p22_p2 = scmp.ge.s32.totalorder %s1196_s23, 4   ;;  %s1360_s17 = smov %s1094_s18 }
 0x3ba   : > { %s1361_s18 = smov %s1098_s19  ;;  %s1362_s19 = smov %s1207_s26 }
 0x3bb   : > { %s1363_s20 = smov %s1196_s23  ;;  %24 = sbr.rel (!%p22_p2) target bundleno = 6 (0x6), region = 110 }
 0x3c2   :  { %820 = vsyncpa [#allocation3], 1 }
 0x3c3   :  { %822 = vsyncpa [#allocation3 + $0x1], 1 }

</bundles_post_ra>
